<compile_context>
chip_gen: v6e
topology: v6e:2x2x1
jax: 0.10.0
libtpu: 0.0.40
codegen_flags: <defaults>
</compile_context>

<pallas_src>
import math

import jax
import jax.numpy as jnp
from jax import lax
from jax.experimental import pallas as pl
from jax.experimental.pallas import tpu as pltpu

BN_EPS = 1e-5
_INV_SQRT2 = 1.0 / math.sqrt(2.0)
_TANH_C = math.sqrt(2.0 / math.pi)

# Rows of the [n, TN] f32 epilogue processed per step when n is large (keeps
# live f32 temporaries ~ ROW_CHUNK*TN*4 B instead of n*TN*4 B).
ROW_CHUNK = 512


def _round_up(x, m):
    return ((x + m - 1) // m) * m


def _gelu(z, approximate):
    if approximate:
        # tanh form -> EUP (its own bundle slot); slight deviation from erf.
        return 0.5 * z * (1.0 + jnp.tanh(_TANH_C * (z + 0.044715 * z * z * z)))
    # exact erf form = PyTorch nn.GELU() default (approximate='none')
    return 0.5 * z * (1.0 + lax.erf(z * _INV_SQRT2))


def _bn_scale_shift(params_ref, s, ss, n):
    """Fused train-mode BN affine: returns (scale, shift), z = y*scale + shift."""
    inv_n = 1.0 / n
    mean = s * inv_n
    var = ss * inv_n - mean * mean            # biased variance (BN train mode)
    gamma = params_ref[0:1, :]
    beta = params_ref[1:2, :]
    scale = gamma * lax.rsqrt(var + BN_EPS)   # EUP rsqrt (free slot)
    shift = beta - mean * scale
    return scale, shift


# ----------------------------------------------------------------------------
# Kernels
# ----------------------------------------------------------------------------
def _make_fused_kernel(approximate_gelu):
    """All-at-once body for small/medium n (everything stays in vregs)."""

    def kernel(x_ref, w_ref, params_ref, o_ref):
        n = x_ref.shape[0]
        # Linear, no bias: a pre-BN bias cancels exactly under train-mode BN.
        # bf16 operands -> MXU, f32 accumulation.
        y = jnp.dot(x_ref[...], w_ref[...], preferred_element_type=jnp.float32)
        s = jnp.sum(y, axis=0, keepdims=True)
        ss = jnp.sum(y * y, axis=0, keepdims=True)
        scale, shift = _bn_scale_shift(params_ref, s, ss, n)
        z = y * scale + shift
        o_ref[...] = _gelu(z, approximate_gelu).astype(o_ref.dtype)

    return kernel


def _make_chunked_kernel(n, row_chunk, approximate_gelu):
    """Large-n body: y staged in VMEM scratch, epilogue streamed in row chunks."""
    num_full = n // row_chunk
    tail = n - num_full * row_chunk

    def kernel(x_ref, w_ref, params_ref, o_ref, y_ref):
        tn = o_ref.shape[1]

        # --- Pass 1: chunked matmul -> y scratch, accumulate sum / sumsq ----
        def mm_chunk(start, size):
            y = jnp.dot(x_ref[pl.ds(start, size), :], w_ref[...],
                        preferred_element_type=jnp.float32)
            y_ref[pl.ds(start, size), :] = y
            return (jnp.sum(y, axis=0, keepdims=True),
                    jnp.sum(y * y, axis=0, keepdims=True))

        def stat_body(i, carry):
            s, ss = carry
            ds, dss = mm_chunk(pl.multiple_of(i * row_chunk, row_chunk),
                               row_chunk)
            return s + ds, ss + dss

        zero = jnp.zeros((1, tn), jnp.float32)
        s, ss = lax.fori_loop(0, num_full, stat_body, (zero, zero))
        if tail:  # static Python tail handling (n, row_chunk are trace-time)
            ds, dss = mm_chunk(num_full * row_chunk, tail)
            s, ss = s + ds, ss + dss

        scale, shift = _bn_scale_shift(params_ref, s, ss, n)

        # --- Pass 2: chunked normalise + GELU -> output ----------------------
        def ep_chunk(start, size):
            y = y_ref[pl.ds(start, size), :]
            z = y * scale + shift
            o_ref[pl.ds(start, size), :] = (
                _gelu(z, approximate_gelu).astype(o_ref.dtype))

        def ep_body(i, _):
            ep_chunk(pl.multiple_of(i * row_chunk, row_chunk), row_chunk)
            return 0

        lax.fori_loop(0, num_full, ep_body, 0)
        if tail:
            ep_chunk(num_full * row_chunk, tail)

    return kernel


# ----------------------------------------------------------------------------
# VMEM-budget-driven tiling
# ----------------------------------------------------------------------------
def _vmem_capacity_bytes():
    """Per-core VMEM capacity (128 MiB v5e/v6e, 64 MiB per TC on v7x)."""
    default = 64 << 20  # conservative fallback = v7x per-TC
    try:
        info = pltpu.get_tpu_info()
    except Exception:
        return default
    for attr in ("vmem_capacity_bytes", "vmem_bytes", "vmem_size_bytes"):
        cap = getattr(info, attr, None)
        if cap:
            return int(cap)
    return default


def _vmem_estimate(n, inp, tn, out_bytes, w_depth, chunked, row_chunk):
    n8 = max(n, 8)
    est = 2 * n8 * inp * 2                    # x (bf16), counted double-buffered
    est += w_depth * inp * tn * 2             # W column tiles (bf16), pipelined
    est += 2 * 8 * tn * 4                     # params tiles (2 rows -> 8 sublanes)
    est += 2 * n8 * tn * out_bytes            # output tiles, double-buffered
    if chunked:
        est += n8 * tn * 4                           # y scratch
        est += 4 * min(n8, row_chunk) * tn * 4       # live f32 temps per chunk
    else:
        est += 4 * n8 * tn * 4                       # live f32 temps (y, y*y, z, g)
    return est


def _select_tiling(n, inp, oup, out_bytes, row_chunk):
    capacity = _vmem_capacity_bytes()
    budget = int(0.85 * capacity)
    chunked = n > row_chunk
    oup_128 = _round_up(oup, 128)

    # Candidates: multiples of 256 (v6e/v7x MXU column width), plus the full
    # 128-rounded width as a single tile (no padding waste), 128 last resort.
    base = [c for c in (2048, 1536, 1024, 768, 512, 384, 256) if c <= oup_128]
    if oup_128 <= 2048:
        base.append(oup_128)
    cands = sorted(set(base), reverse=True)
    if 128 not in cands:
        cands.append(128)

    tn = 128
    for c in cands:
        if _vmem_estimate(n, inp, c, out_bytes, 2, chunked, row_chunk) <= budget:
            tn = c
            break
    # TODO(synk): if even TN=128 overflows the budget (huge resident n*inp),
    # split the batch across a second grid axis instead of relying on spill.

    oup_p = _round_up(oup, tn)
    # If everything landed in one very wide tile, split it in two (no extra
    # padding) so both v7x TensorCores get a column tile.
    if oup_p // tn == 1 and tn >= 1024 and (tn // 2) % 128 == 0:
        tn //= 2

    grid_len = oup_p // tn
    w_depth = 2
    if (grid_len >= 3 and
            _vmem_estimate(n, inp, tn, out_bytes, 3, chunked, row_chunk) <= budget):
        w_depth = 3

    est = _vmem_estimate(n, inp, tn, out_bytes, w_depth, chunked, row_chunk)
    vmem_limit = min(max(est + (2 << 20), 8 << 20), int(0.92 * capacity))
    return tn, oup_p, w_depth, chunked, vmem_limit


def _make_w_spec(inp, tn, depth):
    index_map = lambda j: (0, j)
    if depth > 2 and hasattr(pl, "Buffered"):
        try:
            return pl.BlockSpec((inp, tn), index_map,
                                pipeline_mode=pl.Buffered(depth))
        except TypeError:
            pass
    return pl.BlockSpec((inp, tn), index_map)


# ----------------------------------------------------------------------------
# Wrappers
# ----------------------------------------------------------------------------
def prepare_generator_block_params(weight, gamma, beta, oup_p,
                                   compute_dtype=jnp.bfloat16):
    """One-time weight prep: transpose+cast+pad W, pack [gamma; beta].

    Call this once per step (weights are static within a step); doing it per
    call adds ~1.5x W HBM traffic in the DMA-bound regime.
    """
    oup, _ = weight.shape
    pad = oup_p - oup
    w_t = weight.T.astype(compute_dtype)                  # [inp, oup]
    if pad:
        w_t = jnp.pad(w_t, ((0, 0), (0, pad)))
        gamma = jnp.pad(gamma, (0, pad))
        beta = jnp.pad(beta, (0, pad))
    params = jnp.stack([gamma, beta], axis=0).astype(jnp.float32)   # [2, oup_p]
    return w_t, params


def linear_generator_block_apply(x, w_t, params, *, tn, w_depth=2, chunked=None,
                                 out_dtype=None, approximate_gelu=False,
                                 row_chunk=ROW_CHUNK, vmem_limit=None,
                                 compute_dtype=jnp.bfloat16):
    """Run the fused kernel on pre-prepared (transposed/padded/cast) weights."""
    n, inp = x.shape
    oup_p = w_t.shape[1]
    assert oup_p % tn == 0 and oup_p % 128 == 0
    out_dtype = out_dtype if out_dtype is not None else x.dtype
    if chunked is None:
        chunked = n > row_chunk
    if vmem_limit is None:
        est = _vmem_estimate(n, inp, tn, jnp.dtype(out_dtype).itemsize,
                             w_depth, chunked, row_chunk)
        vmem_limit = min(max(est + (2 << 20), 8 << 20),
                         int(0.92 * _vmem_capacity_bytes()))

    x_c = x.astype(compute_dtype)

    in_specs = [
        pl.BlockSpec((n, inp), lambda j: (0, 0)),    # x: resident across grid
        _make_w_spec(inp, tn, w_depth),              # W column tile (pipelined)
        pl.BlockSpec((2, tn), lambda j: (0, j)),     # [gamma; beta] tile
    ]
    out_spec = pl.BlockSpec((n, tn), lambda j: (0, j))

    if chunked:
        kernel = _make_chunked_kernel(n, row_chunk, approximate_gelu)
        scratch = [pltpu.VMEM((n, tn), jnp.float32)]
    else:
        kernel = _make_fused_kernel(approximate_gelu)
        scratch = []

    return pl.pallas_call(
        kernel,
        out_shape=jax.ShapeDtypeStruct((n, oup_p), out_dtype),
        grid=(oup_p // tn,),
        in_specs=in_specs,
        out_specs=out_spec,
        scratch_shapes=scratch,
        compiler_params=pltpu.CompilerParams(
            # "parallel" lets v7x shard column tiles across its two TCs
            # (each TC then keeps its own resident copy of x).
            dimension_semantics=("parallel",),
            vmem_limit_bytes=vmem_limit,
        ),
    )(x_c, w_t, params)


def linear_generator_block(x, weight, bias, gamma, beta, *,
                           out_dtype=None, approximate_gelu=False,
                           compute_dtype=jnp.bfloat16, row_chunk=ROW_CHUNK):
    """Fused Linear -> BatchNorm1d (train-mode batch stats) -> GELU.

    x:      [N, inp]   float32
    weight: [oup, inp] PyTorch nn.Linear layout
    bias:   [oup]      unused: a pre-BN bias cancels exactly under train-mode
                       (batch-statistics) BatchNorm1d.  NOTE: with eval-mode
                       running stats the bias would NOT cancel.
    gamma, beta: [oup] BatchNorm1d affine parameters.
    """
    del bias  # exactly cancelled by the batch-mean subtraction (train mode)
    n, inp = x.shape
    oup = weight.shape[0]
    out_dtype = out_dtype if out_dtype is not None else x.dtype

    tn, oup_p, w_depth, chunked, vmem_limit = _select_tiling(
        n, inp, oup, jnp.dtype(out_dtype).itemsize, row_chunk)
    w_t, params = prepare_generator_block_params(
        weight, gamma, beta, oup_p, compute_dtype=compute_dtype)
    out = linear_generator_block_apply(
        x, w_t, params, tn=tn, w_depth=w_depth, chunked=chunked,
        out_dtype=out_dtype, approximate_gelu=approximate_gelu,
        row_chunk=row_chunk, vmem_limit=vmem_limit, compute_dtype=compute_dtype)
    return out[:, :oup] if oup_p != oup else out


# ----------------------------------------------------------------------------
# Reference + self-test
# ----------------------------------------------------------------------------
def _reference(x, weight, bias, gamma, beta, matmul_dtype=jnp.float32):
    """PyTorch-equivalent reference (Linear w/ bias -> BN train -> erf GELU)."""
    y = jnp.dot(x.astype(matmul_dtype), weight.T.astype(matmul_dtype),
                preferred_element_type=jnp.float32)
    y = y + bias
    mean = jnp.mean(y, axis=0, keepdims=True)
    var = jnp.mean((y - mean) ** 2, axis=0, keepdims=True)
    z = gamma * (y - mean) * lax.rsqrt(var + BN_EPS) + beta
    return 0.5 * z * (1.0 + lax.erf(z * _INV_SQRT2))


if __name__ == "__main__":
    key = jax.random.PRNGKey(0)
    k_x, k_w, k_b = jax.random.split(key, 3)

    N, INP, OUP = 8, 32, 64

    x = jax.random.normal(k_x, (N, INP), dtype=jnp.float32)
    # PyTorch-style init: Linear weight/bias ~ U(-1/sqrt(inp), 1/sqrt(inp))
    bound = 1.0 / math.sqrt(INP)
    weight = jax.random.uniform(k_w, (OUP, INP), minval=-bound, maxval=bound,
                                dtype=jnp.float32)
    bias = jax.random.uniform(k_b, (OUP,), minval=-bound, maxval=bound,
                              dtype=jnp.float32)
    gamma = jnp.ones((OUP,), dtype=jnp.float32)   # BatchNorm1d init
    beta = jnp.zeros((OUP,), dtype=jnp.float32)

    # --- main (fused, all-at-once) path -------------------------------------
    out = linear_generator_block(x, weight, bias, gamma, beta)
    out = jax.block_until_ready(out)
    assert out.shape == (N, OUP) and out.dtype == jnp.float32

    # Tight check vs. a reference using the same bf16-operand matmul.
    ref_bf16 = _reference(x, weight, bias, gamma, beta, matmul_dtype=jnp.bfloat16)
    assert jnp.allclose(out, ref_bf16, atol=1e-3, rtol=1e-3), "mismatch vs bf16 ref"
    # Loose check vs. the full-f32 PyTorch-equivalent reference.
    ref_f32 = _reference(x, weight, bias, gamma, beta, matmul_dtype=jnp.float32)
    assert jnp.allclose(out, ref_f32, atol=3e-2, rtol=3e-2), "mismatch vs f32 ref"

    # --- exercise the large-batch row-chunked path at small scale -----------
    N2 = 24
    x2 = jax.random.normal(jax.random.PRNGKey(1), (N2, INP), dtype=jnp.float32)
    out2 = linear_generator_block(x2, weight, bias, gamma, beta, row_chunk=8)
    out2 = jax.block_until_ready(out2)
    ref2 = _reference(x2, weight, bias, gamma, beta, matmul_dtype=jnp.bfloat16)
    assert jnp.allclose(out2, ref2, atol=1e-3, rtol=1e-3), "mismatch (chunked path)"

    print("KERNEL_OK")
</pallas_src>

<mosaic_0001>
module attributes {stable_mosaic.version = 11 : i64} {
  func.func @kernel(%arg0: i32, %arg1: memref<8x32xbf16, #tpu.memory_space<vmem>>, %arg2: memref<32x128xbf16, #tpu.memory_space<vmem>>, %arg3: memref<2x128xf32, #tpu.memory_space<vmem>>, %arg4: memref<8x128xf32, #tpu.memory_space<vmem>>) attributes {dimension_semantics = [#tpu.dimension_semantics<parallel>], iteration_bounds = array<i64: 1>, scalar_prefetch = 0 : i64, scratch_operands = 0 : i64, tpu.core_type = #tpu.core_type<tc>, window_params = [{pipeline_mode = #tpu.pipeline_mode<synchronous>, transform_indices = @transform_0, window_bounds = array<i64: 8, 32>}, {transform_indices = @transform_1, window_bounds = array<i64: 32, 128>}, {transform_indices = @transform_2, window_bounds = array<i64: 2, 128>}, {transform_indices = @transform_3, window_bounds = array<i64: 8, 128>}]} {
    %c0 = arith.constant 0 : index
    %c0_0 = arith.constant 0 : index
    %0 = vector.load %arg1[%c0, %c0_0] : memref<8x32xbf16, #tpu.memory_space<vmem>>, vector<8x32xbf16>
    %c0_1 = arith.constant 0 : index
    %c0_2 = arith.constant 0 : index
    %1 = vector.load %arg2[%c0_1, %c0_2] : memref<32x128xbf16, #tpu.memory_space<vmem>>, vector<32x128xbf16>
    %cst = arith.constant dense<0.000000e+00> : vector<8x128xf32>
    %2 = tpu.matmul %0, %1, %cst {dimension_numbers = #tpu.dot_dimension_numbers<[1], [0], [0], [1], [0, 0, 1, 1], [], []>} : vector<8x32xbf16>, vector<32x128xbf16>, vector<8x128xf32> -> vector<8x128xf32>
    %cst_3 = arith.constant dense<0.000000e+00> : vector<128xf32>
    %3 = vector.multi_reduction <add>, %2, %cst_3 [0] : vector<8x128xf32> to vector<128xf32>
    %4 = vector.shape_cast %3 : vector<128xf32> to vector<1x128xf32>
    %5 = arith.mulf %2, %2 : vector<8x128xf32>
    %cst_4 = arith.constant dense<0.000000e+00> : vector<128xf32>
    %6 = vector.multi_reduction <add>, %5, %cst_4 [0] : vector<8x128xf32> to vector<128xf32>
    %7 = vector.shape_cast %6 : vector<128xf32> to vector<1x128xf32>
    %cst_5 = arith.constant 1.250000e-01 : f32
    %8 = vector.broadcast %cst_5 : f32 to vector<1x128xf32>
    %9 = arith.mulf %4, %8 : vector<1x128xf32>
    %cst_6 = arith.constant 1.250000e-01 : f32
    %10 = vector.broadcast %cst_6 : f32 to vector<1x128xf32>
    %11 = arith.mulf %7, %10 : vector<1x128xf32>
    %12 = arith.mulf %9, %9 : vector<1x128xf32>
    %13 = arith.subf %11, %12 : vector<1x128xf32>
    %c0_7 = arith.constant 0 : index
    %c0_8 = arith.constant 0 : index
    %14 = vector.load %arg3[%c0_7, %c0_8] : memref<2x128xf32, #tpu.memory_space<vmem>>, vector<1x128xf32>
    %c1 = arith.constant 1 : index
    %c0_9 = arith.constant 0 : index
    %15 = vector.load %arg3[%c1, %c0_9] : memref<2x128xf32, #tpu.memory_space<vmem>>, vector<1x128xf32>
    %cst_10 = arith.constant 9.99999974E-6 : f32
    %16 = vector.broadcast %cst_10 : f32 to vector<1x128xf32>
    %17 = arith.addf %13, %16 : vector<1x128xf32>
    %18 = math.rsqrt %17 : vector<1x128xf32>
    %19 = arith.mulf %14, %18 : vector<1x128xf32>
    %20 = arith.mulf %9, %19 : vector<1x128xf32>
    %21 = arith.subf %15, %20 : vector<1x128xf32>
    %22 = vector.broadcast %19 : vector<1x128xf32> to vector<8x128xf32>
    %23 = arith.mulf %2, %22 : vector<8x128xf32>
    %24 = vector.broadcast %21 : vector<1x128xf32> to vector<8x128xf32>
    %25 = arith.addf %23, %24 : vector<8x128xf32>
    %cst_11 = arith.constant 5.000000e-01 : f32
    %26 = vector.broadcast %cst_11 : f32 to vector<8x128xf32>
    %27 = arith.mulf %26, %25 : vector<8x128xf32>
    %cst_12 = arith.constant 0.707106769 : f32
    %28 = vector.broadcast %cst_12 : f32 to vector<8x128xf32>
    %29 = arith.mulf %25, %28 : vector<8x128xf32>
    %30 = math.erf %29 : vector<8x128xf32>
    %cst_13 = arith.constant 1.000000e+00 : f32
    %31 = vector.broadcast %cst_13 : f32 to vector<8x128xf32>
    %32 = arith.addf %31, %30 : vector<8x128xf32>
    %33 = arith.mulf %27, %32 : vector<8x128xf32>
    %c0_14 = arith.constant 0 : index
    %c0_15 = arith.constant 0 : index
    %34 = vector.load %arg4[%c0_14, %c0_15] : memref<8x128xf32, #tpu.memory_space<vmem>>, vector<8x128xf32>
    tpu.vector_store %arg4[%c0_14, %c0_15], %33 {strides = array<i32>} : memref<8x128xf32, #tpu.memory_space<vmem>>, vector<8x128xf32>,
    return
  }
  func.func @transform_0(%arg0: i32) -> (i32, i32) {
    %c0_i32 = arith.constant 0 : i32
    %c0_i32_0 = arith.constant 0 : i32
    %c0_i32_1 = arith.constant 0 : i32
    return %c0_i32, %c0_i32_0 : i32, i32
  }
  func.func @transform_1(%arg0: i32) -> (i32, i32) {
    %c0_i32 = arith.constant 0 : i32
    %c0_i32_0 = arith.constant 0 : i32
    return %c0_i32, %arg0 : i32, i32
  }
  func.func @transform_2(%arg0: i32) -> (i32, i32) {
    %c0_i32 = arith.constant 0 : i32
    %c0_i32_0 = arith.constant 0 : i32
    return %c0_i32, %arg0 : i32, i32
  }
  func.func @transform_3(%arg0: i32) -> (i32, i32) {
    %c0_i32 = arith.constant 0 : i32
    %c0_i32_0 = arith.constant 0 : i32
    return %c0_i32, %arg0 : i32, i32
  }
}

</mosaic_0001>

<bundles_post_ra>
// kernel: tpu_custom_call.1
= control target key start
LH: loop header
LB: loop body
LE: loop exit
PB: predicated region body
PF: predicated region fallthrough
CT: control target
= control target key end

     0   :  { %8 = vsyncpa [#allocation3], 0  ;;  %s294_s0 = inlined_call_operand.hbm [shape: bf16[8,32], index: 0, kind: input, shape index: {}]   ;;  %s295_s1 = inlined_call_operand.hbm [shape: bf16[32,128], index: 1, kind: input, shape index: {}]   ;;  %s296_s2 = inlined_call_operand.vmem [shape: f32[2,128], index: 2, kind: input, shape index: {}]   ;;  %s297_s3 = inlined_call_operand.hbm [shape: f32[8,128], index: 3, kind: output, shape index: {}]  }
   0x1   :  { %9 = vsyncpa [#allocation6], 0 }
   0x2   :  { %10 = vsyncpa [#allocation4], 0  ;;  %s252_s12 = smov [#allocation2]   ;;  %s253_s14 = smov [#allocation5]  }
   0x3   :  { %s17_s13 = sshll.u32 %s252_s12, 4  ;;  %s26_s15 = sshll.u32 %s253_s14, 4  ;;  %s18_s13 = int_to_ptr.vmem [resolvable:$true] %s17_s13  ;;  %s27_s15 = int_to_ptr.vmem [resolvable:$true] %s26_s15 }
   0x4   :  { %s194_s16 = scalar_lea.vmem %s18_s13, 64  ;;  %p199_p1 = scmp.lt.s32.totalorder %s18_s13, %s18_s13 }
   0x5   :  { %p195_p0 = scmp.ne.s32.totalorder %s18_s13, %s194_s16  ;;  %p200_p2 = scmp.lt.s32.totalorder %s194_s16, %s194_s16 }
   0x7   :  { %p201_p3 = por %p200_p2, %p199_p1 }
   0x9   :  { %p202_p4 = pnand %p201_p3, %p195_p0 }
   0xb   :  { %205 = shalt.err (!%p202_p4)
}
   0xc   :  { %20 = dma.hbm_to_vmem [thread:$0]  %s294_s0, 64, %s18_s13, [#allocation3]  }
   0xd   :  { %s214_s19 = scalar_lea.vmem %s27_s15, 256  ;;  %p219_p6 = scmp.lt.s32.totalorder %s27_s15, %s27_s15 }
   0xe   :  { %p215_p5 = scmp.ne.s32.totalorder %s27_s15, %s214_s19  ;;  %p220_p7 = scmp.lt.s32.totalorder %s214_s19, %s214_s19 }
  0x10   :  { %p221_p8 = por %p220_p7, %p219_p6 }
  0x12   :  { %p222_p9 = pnand %p221_p8, %p215_p5 }
  0x14   :  { %225 = shalt.err (!%p222_p9)
}
  0x15   :  { %s254_s20 = smov 64   ;;  %s255_s21 = smov 4  }
  0x16   :  { %32 = dma.hbm_to_vmem [thread:$0]  %s295_s1, 256, %s27_s15, [#allocation6], %s254_s20, %s254_s20, %s255_s21  }
  0x17   :  { %246 = dma.done.wait [#allocation3], 64  }
  0x18   :  { %247 = vsyncadd [#allocation3], 4294967232 }
  0x19   :  { %248 = dma.done.wait [#allocation6], 256  }
  0x1a   :  { %249 = vsyncadd [#allocation6], 4294967040  ;;  %v256_v0 = vmov 0.0   ;;  %vm257_vm0 = vmmov 0   ;;  %v180_v1 = vld [vmem:[#allocation5 + $0x8] sm:$0xff]   ;;  %v181_v2 = vld [vmem:[#allocation5] sm:$0xff]   ;;  %v127_v26 = vlaneseq }
  0x1b   :  { %165 = vmatprep.subr.bf16.mxu0 %v256_v0  ;;  %169 = vmatprep.mubr.msk.bf16.mxu0 %vm257_vm0, %v256_v0  ;;  %v42_v3 = vld [vmem:[#allocation2] sm:$0xf]  ;;  %vm59_vm1 = vcmask 261120   ;;  %s258_s26 = smov [#allocation7]  }
  0x1c   :  { %166 = vmatpush3.bf16.msra.mxu0 %v180_v1  ;;  %v128_v27 = vshrl.u32 %v127_v26, 7  ;;  %v120_v28 = vld [vmem:[%s296_s2] sm:$0x1]  ;;  %v121_v32 = vld [vmem:[%s296_s2 + $0x1] sm:$0x1]  ;;  %s149_s27 = sshll.u32 %s258_s26, 4  ;;  %s150_s27 = int_to_ptr.vmem [resolvable:$true] %s149_s27 }
  0x1d   :  { %167 = vmatprep.subr.bf16.mxu0 %v256_v0  ;;  %s226_s28 = scalar_lea.vmem %s150_s27, 128  ;;  %p231_p11 = scmp.lt.s32.totalorder %s150_s27, %s150_s27 }
  0x1e   :  { %v129_v29 = vsub.s32 0, %v128_v27  ;;  %p227_p10 = scmp.ne.s32.totalorder %s150_s27, %s226_s28  ;;  %p232_p12 = scmp.lt.s32.totalorder %s226_s28, %s226_s28 }
  0x20   :  { %168 = vmatpush3.bf16.msra.mxu0 %v181_v2  ;;  %p233_p13 = por %p232_p12, %p231_p11 }
  0x22   :  { %p234_p0 = pnand %p233_p13, %p227_p10 }
  0x23   :  { %170 = vmatmul.mubr.msk.bf16.vlgmr.msra.gmra.mxu0 %vm59_vm1, %v42_v3 }
  0xe3   :  { %v97_v4 = vpop.f32.mrf.mxu0 }
  0xe4   :  { %v103_v5 = vrot.slane %v97_v4, 4  ;;  %v109_v6 = vmul.f32 %v97_v4, %v97_v4 }
  0xe5   :  { %v171_v7 = vpop.f32.mrf.mxu0 }
  0xe6   :  { %v104_v8 = vadd.f32 %v103_v5, %v97_v4  ;;  %v110_v9 = vrot.slane %v109_v6, 4 }
  0xe7   :  { %v100_v10 = vpop.f32.mrf.mxu0 }
  0xe8   :  { %v105_v11 = vrot.slane %v104_v8, 2  ;;  %v111_v12 = vadd.f32 %v110_v9, %v109_v6 }
  0xe9   :  { %v172_v13 = vpop.f32.mrf.mxu0 }
  0xea   :  { %v106_v14 = vadd.f32 %v105_v11, %v104_v8  ;;  %v112_v15 = vrot.slane %v111_v12, 2 }
  0xec   :  { %v107_v16 = vrot.slane %v106_v14, 1  ;;  %v113_v17 = vadd.f32 %v112_v15, %v111_v12 }
  0xee   :  { %v108_v18 = vadd.f32 %v107_v16, %v106_v14  ;;  %v114_v19 = vrot.slane %v113_v17, 1 }
  0xf0   :  { %v115_v20 = vadd.f32 %v114_v19, %v113_v17  ;;  %v116_v21 = vmul.f32 0.125, %v108_v18 }
  0xf2   :  { %v117_v22 = vmul.f32 0.125, %v115_v20  ;;  %v118_v23 = vmul.f32 %v116_v21, %v116_v21 }
  0xf4   :  { %v119_v24 = vsub.f32 %v117_v22, %v118_v23 }
  0xf6   :  { %v122_v25 = vadd.f32 1e-05, %v119_v24 }
  0xf8   :  { %182 = vrsqrt.f32 %v122_v25 }
 0x105   :  { %v183_v30 = vpop.eup %182 }
 0x106   :  { %v124_v31 = vmul.f32 %v183_v30, %v120_v28 }
 0x108   :  { %v125_v33 = vmul.f32 %v124_v31, %v116_v21  ;;  %v130_v34 = vrot.slane %v124_v31, %v129_v29 }
 0x10a   :  { %v126_v35 = vsub.f32 %v121_v32, %v125_v33  ;;  %v131_v36 = vmul.f32 %v130_v34, %v97_v4 }
 0x10c   :  { %v135_v37 = vrot.slane %v126_v35, %v129_v29 }
 0x10e   :  { %v136_v38 = vadd.f32 %v135_v37, %v131_v36 }
 0x110   :  { %v138_v39 = vmul.f32 0.70710677, %v136_v38  ;;  %v137_v41 = vmul.f32 0.5, %v136_v38 }
 0x112   :  { %184 = verf.f32 %v138_v39 }
 0x11f   :  { %v185_v40 = vpop.eup %184 }
 0x120   :  { %v140_v42 = vadd.f32 1.0, %v185_v40 }
 0x122   :  { %v141_v43 = vmul.f32 %v140_v42, %v137_v41 }
 0x124   :  { %142 = vst [vmem:[#allocation7] sm:$0xff] %v141_v43 }
 0x125   :  { %237 = shalt.err (!%p234_p0)
}
 0x126   :  { %152 = dma.vmem_to_hbm [thread:$0]  %s150_s27, 128, %s297_s3, [#allocation4]  }
 0x127   :  { %250 = dma.done.wait [#allocation4], 128  }
 0x128   :  { %251 = vsyncadd [#allocation4], 4294967168 }
 0x129   :  { %156 = vsyncpa [#allocation3], 1 }
 0x12a   :  { %157 = vsyncpa [#allocation6], 1 }
 0x12b   :  { %158 = vsyncpa [#allocation4], 1 }

</bundles_post_ra>
